<compile_context>
chip_gen: v5e
topology: v5e:2x2
jax: 0.10.0
libtpu: 0.0.40
codegen_flags: <defaults>
</compile_context>

<pallas_src>
import jax
import jax.numpy as jnp
from jax.experimental import pallas as pl
from jax.experimental.pallas import tpu as pltpu

_LANES = 128
_MAX_TILE_ROWS = 4096   # 4096x128 f32 tile = 2 MiB; 2 in + 2 out buffers = 8 MiB VMEM


def _sublane_granularity(dtype) -> int:
    # f32 -> 8, bf16 -> 16, int8/fp8 -> 32 (packed sublanes)
    return {4: 8, 2: 16, 1: 32}[jnp.dtype(dtype).itemsize]


def _round_up(v: int, m: int) -> int:
    return ((v + m - 1) // m) * m


def _linreg_kernel(w_ref, b_ref, x_ref, o_ref):
    # w_ref / b_ref: (1, 1) scalars in SMEM.
    # x_ref / o_ref: (tile_rows, 128) lane-dense tiles in VMEM.
    o_ref[...] = x_ref[...] * w_ref[0, 0] + b_ref[0, 0]   # VPU fused scale + shift


def _forward(x, weight, bias):
    """x: (N, 1), weight: (1, 1), bias: (1,) -> (N, 1)."""
    n, fin = x.shape
    fout = weight.shape[0]
    assert fin == 1 and fout == 1, "linear_regression has in=out=1 features"
    sub = _sublane_granularity(x.dtype)

    # ---- lane-dense view: (N, 1) -> (rows, 128), rows padded only to a sublane multiple
    rows = max(sub, _round_up(pl.cdiv(n, _LANES), sub))
    n_pad = rows * _LANES

    if rows <= sub:
        tile_rows = rows
    elif rows <= 2 * _MAX_TILE_ROWS:
        # Split into two ~equal tiles so both TensorCores get work on v7x.
        tile_rows = _round_up(pl.cdiv(rows, 2), sub)
    else:
        tile_rows = _MAX_TILE_ROWS
    grid = (pl.cdiv(rows, tile_rows),)        # ragged last block handled by Pallas

    flat = x.reshape(-1)
    if n_pad != n:
        flat = jnp.pad(flat, (0, n_pad - n))
    x2d = flat.reshape(rows, _LANES)

    w2 = weight.reshape(1, 1)
    b2 = bias.reshape(1, 1)

    out2d = pl.pallas_call(
        _linreg_kernel,
        out_shape=jax.ShapeDtypeStruct((rows, _LANES), x.dtype),
        grid=grid,
        in_specs=[
            pl.BlockSpec(memory_space=pltpu.MemorySpace.SMEM),    # weight scalar
            pl.BlockSpec(memory_space=pltpu.MemorySpace.SMEM),    # bias scalar
            pl.BlockSpec((tile_rows, _LANES), lambda i: (i, 0)),  # x tile
        ],
        out_specs=pl.BlockSpec((tile_rows, _LANES), lambda i: (i, 0)),
        compiler_params=pltpu.CompilerParams(
            dimension_semantics=("parallel",),          # shard rows across TCs (v7x)
            # Let XLA fuse the pad/reshape producer of x2d into the kernel's
            # input stream instead of materializing the padded slab in HBM.
            allow_input_fusion=[False, False, True],
        ),
    )(w2, b2, x2d)

    flat_out = out2d.reshape(-1)
    if n_pad != n:
        flat_out = flat_out[:n]
    return flat_out.reshape(n, fout)


# Single jitted entry point: pad/reshape/slice + pallas_call compile into one
# XLA program (no per-op eager dispatch, temporaries can be fused/elided).
linear_regression_forward = jax.jit(_forward)


if __name__ == "__main__":
    key = jax.random.PRNGKey(0)
    kx, kw, kb, kx2, kx3 = jax.random.split(key, 5)

    in_features, out_features, batch = 1, 1, 8

    # Deterministic parameter init mirroring nn.Linear's U(-1/sqrt(fan_in), 1/sqrt(fan_in))
    bound = 1.0 / (in_features ** 0.5)
    weight = jax.random.uniform(kw, (out_features, in_features),
                                minval=-bound, maxval=bound, dtype=jnp.float32)
    bias = jax.random.uniform(kb, (out_features,),
                              minval=-bound, maxval=bound, dtype=jnp.float32)

    def check(xin):
        y = jax.block_until_ready(linear_regression_forward(xin, weight, bias))
        y_ref = xin @ weight.T + bias
        assert y.shape == y_ref.shape
        assert jnp.allclose(y, y_ref, atol=1e-5, rtol=1e-5)
        return y

    # --- small case matching the module's toy usage (grid = 1) ---
    x = jax.random.normal(kx, (batch, in_features), dtype=jnp.float32)
    check(x)

    # --- medium case: grid = 2 with a ragged last block ---
    xm = jax.random.normal(kx2, (5_000, in_features), dtype=jnp.float32)
    check(xm)

    # --- larger case: exceeds 2 * _MAX_TILE_ROWS rows -> multi-step pipeline ---
    xb = jax.random.normal(kx3, (1_200_000, in_features), dtype=jnp.float32)
    check(xb)

    print("KERNEL_OK")
</pallas_src>

<mosaic_0001>
module attributes {stable_mosaic.version = 11 : i64} {
  func.func @_linreg_kernel(%arg0: i32, %arg1: memref<1x1xf32, #tpu.memory_space<smem>>, %arg2: memref<1x1xf32, #tpu.memory_space<smem>>, %arg3: memref<8x128xf32, #tpu.memory_space<vmem>>, %arg4: memref<8x128xf32, #tpu.memory_space<vmem>>) attributes {dimension_semantics = [#tpu.dimension_semantics<parallel>], iteration_bounds = array<i64: 1>, scalar_prefetch = 0 : i64, scratch_operands = 0 : i64, tpu.core_type = #tpu.core_type<tc>, window_params = [{transform_indices = @transform_0, window_bounds = array<i64: 1, 1>}, {transform_indices = @transform_1, window_bounds = array<i64: 1, 1>}, {transform_indices = @transform_2, window_bounds = array<i64: 8, 128>}, {transform_indices = @transform_3, window_bounds = array<i64: 8, 128>}]} {
    %c0 = arith.constant 0 : index
    %c0_0 = arith.constant 0 : index
    %0 = vector.load %arg3[%c0, %c0_0] : memref<8x128xf32, #tpu.memory_space<vmem>>, vector<8x128xf32>
    %c0_1 = arith.constant 0 : index
    %c0_2 = arith.constant 0 : index
    %1 = memref.load %arg1[%c0_1, %c0_2] : memref<1x1xf32, #tpu.memory_space<smem>>
    %2 = vector.broadcast %1 : f32 to vector<8x128xf32>
    %3 = arith.mulf %0, %2 : vector<8x128xf32>
    %c0_3 = arith.constant 0 : index
    %c0_4 = arith.constant 0 : index
    %4 = memref.load %arg2[%c0_3, %c0_4] : memref<1x1xf32, #tpu.memory_space<smem>>
    %5 = vector.broadcast %4 : f32 to vector<8x128xf32>
    %6 = arith.addf %3, %5 : vector<8x128xf32>
    %c0_5 = arith.constant 0 : index
    %c0_6 = arith.constant 0 : index
    %7 = vector.load %arg4[%c0_5, %c0_6] : memref<8x128xf32, #tpu.memory_space<vmem>>, vector<8x128xf32>
    tpu.vector_store %arg4[%c0_5, %c0_6], %6 {strides = array<i32>} : memref<8x128xf32, #tpu.memory_space<vmem>>, vector<8x128xf32>,
    return
  }
  func.func @transform_0(%arg0: i32) -> (i32, i32) {
    %c0_i32 = arith.constant 0 : i32
    %c0_i32_0 = arith.constant 0 : i32
    %c0_i32_1 = arith.constant 0 : i32
    return %c0_i32, %c0_i32_0 : i32, i32
  }
  func.func @transform_1(%arg0: i32) -> (i32, i32) {
    %c0_i32 = arith.constant 0 : i32
    %c0_i32_0 = arith.constant 0 : i32
    %c0_i32_1 = arith.constant 0 : i32
    return %c0_i32, %c0_i32_0 : i32, i32
  }
  func.func @transform_2(%arg0: i32) -> (i32, i32) {
    %c0_i32 = arith.constant 0 : i32
    %c0_i32_0 = arith.constant 0 : i32
    return %arg0, %c0_i32 : i32, i32
  }
  func.func @transform_3(%arg0: i32) -> (i32, i32) {
    %c0_i32 = arith.constant 0 : i32
    %c0_i32_0 = arith.constant 0 : i32
    return %arg0, %c0_i32 : i32, i32
  }
}

</mosaic_0001>

<bundles_post_ra>
// kernel: _forward.2
= control target key start
LH: loop header
LB: loop body
LE: loop exit
PB: predicated region body
PF: predicated region fallthrough
CT: control target
= control target key end

     0   :  { %v19_v2 = vlaneseq  ;;  %s78_s0 = inlined_call_operand.<no memory space> [shape: f32[1,1], index: 0, kind: input, shape index: {}]   ;;  %s79_s1 = inlined_call_operand.<no memory space> [shape: f32[1,1], index: 1, kind: input, shape index: {}]   ;;  %s80_s2 = inlined_call_operand.vmem [shape: f32[8], index: 2, kind: input, shape index: {}]   ;;  %s81_s3 = inlined_call_operand.<no memory space> [shape: f32[], index: 3, kind: input, shape index: {}]   ;;  %s82_s4 = inlined_call_operand.vmem [shape: f32[8,128], index: 4, kind: output, shape index: {}]  }
   0x1   :  { %v11_v0 = vstv %s81_s3  ;;  %v18_v1 = vld [vmem:[%s80_s2] sm:$0x1]  ;;  %v28_v3 = vstv %s78_s0  ;;  %v31_v5 = vstv %s79_s1 }
   0x2   :  { %vm21_vm0 = vcmp.lt.s32.totalorder %v19_v2, 8 }
   0x3   :  { %v22_v4 = vsel %vm21_vm0, %v18_v1, %v11_v0 }
   0x4   :  { %v29_v6 = vmul.f32 %v28_v3, %v22_v4 }
   0x6   :  { %v32_v7 = vadd.f32 %v31_v5, %v29_v6 }
   0x8   :  { %33 = vst [vmem:[%s82_s4] sm:$0xff] %v32_v7 }

</bundles_post_ra>
